<compile_context>
chip_gen: v7x
topology: tpu7x:2x2x1
jax: 0.10.0
libtpu: 0.0.40
codegen_flags: <defaults>
</compile_context>

<pallas_src>
import jax
import jax.numpy as jnp
from jax.experimental import pallas as pl
from jax.experimental.pallas import tpu as pltpu


def _round_up(n, m):
    return ((n + m - 1) // m) * m


def policy_kernel(x_ref, w1_ref, b1_ref, w2_ref, b2_ref, out_ref):
    # fc1: bf16 operands on the MXU, f32 accumulation; bias + relu in f32.
    x = x_ref[...].astype(jnp.bfloat16)
    h = jnp.dot(x, w1_ref[...], preferred_element_type=jnp.float32) + b1_ref[...]
    h = jnp.maximum(h, 0.0)

    # fc2 (+ relu). A=4 output columns — no lane padding, full-dim block.
    a = (
        jnp.dot(h.astype(jnp.bfloat16), w2_ref[...], preferred_element_type=jnp.float32)
        + b2_ref[...]
    )
    a = jnp.maximum(a, 0.0)

    # tanh -> t in [0, 1), so exp(t) cannot overflow: skip the softmax max-subtraction.
    t = jnp.tanh(a)
    e = jnp.exp(t)
    denom = jnp.sum(e, axis=1, keepdims=True)
    out_ref[...] = e * pl.reciprocal(denom, approx=True)


def policy_forward(x, w1, b1, w2, b2, *, tm=2048):
    """Fused PolicyNet forward.

    x: [B, S] f32; w1: [S, H]; b1: [1, H]; w2: [H, A]; b2: [1, A].
    Returns softmax probabilities [B, A] in f32.
    """
    B, S = x.shape
    H = w1.shape[1]
    A = w2.shape[1]

    # Weights in bf16 (MXU-native, halves resident VMEM); biases stay f32.
    w1b = w1.astype(jnp.bfloat16)
    w2b = w2.astype(jnp.bfloat16)

    # Batch tile: multiple of 8 sublanes, capped at `tm`.  On v7x (2 TCs) ensure
    # at least 2 grid steps when there is enough batch to split.
    tm_eff = min(tm, _round_up(B, 8))
    if B > 8:
        tm_eff = min(tm_eff, _round_up(pl.cdiv(B, 2), 8))
    grid = (pl.cdiv(B, tm_eff),)

    # NOTE(v7x): if H/S/tm are ever scaled up, re-derive the VMEM budget against
    # v7x's 64 MiB physical / 32 MiB scoped default (inputs are double-buffered)
    # and set vmem_limit_bytes with headroom.  At these sizes we are far below it.
    return pl.pallas_call(
        policy_kernel,
        out_shape=jax.ShapeDtypeStruct((B, A), jnp.float32),
        grid=grid,
        in_specs=[
            pl.BlockSpec((tm_eff, S), lambda i: (i, 0)),   # activations: tiled over batch
            pl.BlockSpec((S, H), lambda i: (0, 0)),        # weights/biases: VMEM-resident
            pl.BlockSpec((1, H), lambda i: (0, 0)),
            pl.BlockSpec((H, A), lambda i: (0, 0)),
            pl.BlockSpec((1, A), lambda i: (0, 0)),
        ],
        out_specs=pl.BlockSpec((tm_eff, A), lambda i: (i, 0)),
        compiler_params=pltpu.CompilerParams(
            dimension_semantics=("parallel",)  # shard batch tiles across TCs on v7x
        ),
    )(x, w1b, b1, w2b, b2)


def init_params(key, state_dim, hidden_dim, action_dim):
    # Deterministic init mimicking torch.nn.Linear default:
    # U(-1/sqrt(fan_in), 1/sqrt(fan_in)) for both weight and bias.
    k1, k2, k3, k4 = jax.random.split(key, 4)
    bnd1 = 1.0 / jnp.sqrt(state_dim)
    bnd2 = 1.0 / jnp.sqrt(hidden_dim)
    w1 = jax.random.uniform(k1, (state_dim, hidden_dim), jnp.float32, -bnd1, bnd1)
    b1 = jax.random.uniform(k2, (1, hidden_dim), jnp.float32, -bnd1, bnd1)
    w2 = jax.random.uniform(k3, (hidden_dim, action_dim), jnp.float32, -bnd2, bnd2)
    b2 = jax.random.uniform(k4, (1, action_dim), jnp.float32, -bnd2, bnd2)
    return w1, b1, w2, b2


def policy_forward_ref(x, w1, b1, w2, b2):
    # Pure-JAX f32 reference for correctness checking.
    h = jnp.maximum(x @ w1 + b1, 0.0)
    a = jnp.maximum(h @ w2 + b2, 0.0)
    t = jnp.tanh(a)
    return jax.nn.softmax(t, axis=1)


if __name__ == "__main__":
    batch = 2
    state_dim = 8
    hidden_dim = 32
    action_dim = 4
    action_bound = 1.0  # unused in forward (matches the PyTorch module)

    key = jax.random.PRNGKey(0)
    kx, kp = jax.random.split(key)
    x = jax.random.normal(kx, (batch, state_dim), dtype=jnp.float32)
    w1, b1, w2, b2 = init_params(kp, state_dim, hidden_dim, action_dim)

    out = policy_forward(x, w1, b1, w2, b2)
    jax.block_until_ready(out)

    # Sanity: shape, softmax rows sum to ~1 (approx reciprocal -> relaxed tol),
    # and agreement with the pure-JAX f32 reference (bf16 matmuls -> relaxed tol).
    assert out.shape == (batch, action_dim)
    assert bool(jnp.all(jnp.isfinite(out)))
    assert jnp.allclose(jnp.sum(out, axis=1), 1.0, atol=5e-3)
    ref = policy_forward_ref(x, w1, b1, w2, b2)
    assert jnp.allclose(out, ref, atol=2e-2, rtol=2e-2)

    print("KERNEL_OK")
</pallas_src>

<mosaic_0001>
module attributes {stable_mosaic.version = 11 : i64} {
  func.func @policy_kernel(%arg0: i32, %arg1: memref<8x8xf32, #tpu.memory_space<vmem>>, %arg2: memref<8x32xbf16, #tpu.memory_space<vmem>>, %arg3: memref<1x32xf32, #tpu.memory_space<vmem>>, %arg4: memref<32x4xbf16, #tpu.memory_space<vmem>>, %arg5: memref<1x4xf32, #tpu.memory_space<vmem>>, %arg6: memref<8x4xf32, #tpu.memory_space<vmem>>) attributes {dimension_semantics = [#tpu.dimension_semantics<parallel>], iteration_bounds = array<i64: 1>, scalar_prefetch = 0 : i64, scratch_operands = 0 : i64, tpu.core_type = #tpu.core_type<tc>, window_params = [{transform_indices = @transform_0, window_bounds = array<i64: 8, 8>}, {pipeline_mode = #tpu.pipeline_mode<synchronous>, transform_indices = @transform_1, window_bounds = array<i64: 8, 32>}, {pipeline_mode = #tpu.pipeline_mode<synchronous>, transform_indices = @transform_2, window_bounds = array<i64: 1, 32>}, {pipeline_mode = #tpu.pipeline_mode<synchronous>, transform_indices = @transform_3, window_bounds = array<i64: 32, 4>}, {pipeline_mode = #tpu.pipeline_mode<synchronous>, transform_indices = @transform_4, window_bounds = array<i64: 1, 4>}, {transform_indices = @transform_5, window_bounds = array<i64: 8, 4>}]} {
    %c0 = arith.constant 0 : index
    %c0_0 = arith.constant 0 : index
    %0 = vector.load %arg1[%c0, %c0_0] : memref<8x8xf32, #tpu.memory_space<vmem>>, vector<8x8xf32>
    %1 = arith.truncf %0 : vector<8x8xf32> to vector<8x8xbf16>
    %c0_1 = arith.constant 0 : index
    %c0_2 = arith.constant 0 : index
    %2 = vector.load %arg2[%c0_1, %c0_2] : memref<8x32xbf16, #tpu.memory_space<vmem>>, vector<8x32xbf16>
    %cst = arith.constant dense<0.000000e+00> : vector<8x32xf32>
    %3 = tpu.matmul %1, %2, %cst {dimension_numbers = #tpu.dot_dimension_numbers<[1], [0], [0], [1], [0, 0, 1, 1], [], []>} : vector<8x8xbf16>, vector<8x32xbf16>, vector<8x32xf32> -> vector<8x32xf32>
    %c0_3 = arith.constant 0 : index
    %c0_4 = arith.constant 0 : index
    %4 = vector.load %arg3[%c0_3, %c0_4] : memref<1x32xf32, #tpu.memory_space<vmem>>, vector<1x32xf32>
    %5 = vector.broadcast %4 : vector<1x32xf32> to vector<8x32xf32>
    %6 = arith.addf %3, %5 : vector<8x32xf32>
    %cst_5 = arith.constant 0.000000e+00 : f32
    %7 = vector.broadcast %cst_5 : f32 to vector<8x32xf32>
    %8 = arith.maximumf %6, %7 : vector<8x32xf32>
    %9 = arith.truncf %8 : vector<8x32xf32> to vector<8x32xbf16>
    %c0_6 = arith.constant 0 : index
    %c0_7 = arith.constant 0 : index
    %10 = vector.load %arg4[%c0_6, %c0_7] : memref<32x4xbf16, #tpu.memory_space<vmem>>, vector<32x4xbf16>
    %cst_8 = arith.constant dense<0.000000e+00> : vector<8x4xf32>
    %11 = tpu.matmul %9, %10, %cst_8 {dimension_numbers = #tpu.dot_dimension_numbers<[1], [0], [0], [1], [0, 0, 1, 1], [], []>} : vector<8x32xbf16>, vector<32x4xbf16>, vector<8x4xf32> -> vector<8x4xf32>
    %c0_9 = arith.constant 0 : index
    %c0_10 = arith.constant 0 : index
    %12 = vector.load %arg5[%c0_9, %c0_10] : memref<1x4xf32, #tpu.memory_space<vmem>>, vector<1x4xf32>
    %13 = vector.broadcast %12 : vector<1x4xf32> to vector<8x4xf32>
    %14 = arith.addf %11, %13 : vector<8x4xf32>
    %cst_11 = arith.constant 0.000000e+00 : f32
    %15 = vector.broadcast %cst_11 : f32 to vector<8x4xf32>
    %16 = arith.maximumf %14, %15 : vector<8x4xf32>
    %17 = math.tanh %16 : vector<8x4xf32>
    %18 = math.exp %17 : vector<8x4xf32>
    %cst_12 = arith.constant dense<0.000000e+00> : vector<8xf32>
    %19 = vector.multi_reduction <add>, %18, %cst_12 [1] : vector<8x4xf32> to vector<8xf32>
    %20 = vector.shape_cast %19 : vector<8xf32> to vector<8x1xf32>
    %21 = tpu.reciprocal %20 {approx = true} : vector<8x1xf32> -> vector<8x1xf32>
    %22 = vector.broadcast %21 : vector<8x1xf32> to vector<8x4xf32>
    %23 = arith.mulf %18, %22 : vector<8x4xf32>
    %c0_13 = arith.constant 0 : index
    %c0_14 = arith.constant 0 : index
    %24 = vector.load %arg6[%c0_13, %c0_14] : memref<8x4xf32, #tpu.memory_space<vmem>>, vector<8x4xf32>
    tpu.vector_store %arg6[%c0_13, %c0_14], %23 {strides = array<i32>} : memref<8x4xf32, #tpu.memory_space<vmem>>, vector<8x4xf32>,
    return
  }
  func.func @transform_0(%arg0: i32) -> (i32, i32) {
    %c0_i32 = arith.constant 0 : i32
    %c0_i32_0 = arith.constant 0 : i32
    return %arg0, %c0_i32 : i32, i32
  }
  func.func @transform_1(%arg0: i32) -> (i32, i32) {
    %c0_i32 = arith.constant 0 : i32
    %c0_i32_0 = arith.constant 0 : i32
    %c0_i32_1 = arith.constant 0 : i32
    return %c0_i32, %c0_i32_0 : i32, i32
  }
  func.func @transform_2(%arg0: i32) -> (i32, i32) {
    %c0_i32 = arith.constant 0 : i32
    %c0_i32_0 = arith.constant 0 : i32
    %c0_i32_1 = arith.constant 0 : i32
    return %c0_i32, %c0_i32_0 : i32, i32
  }
  func.func @transform_3(%arg0: i32) -> (i32, i32) {
    %c0_i32 = arith.constant 0 : i32
    %c0_i32_0 = arith.constant 0 : i32
    %c0_i32_1 = arith.constant 0 : i32
    return %c0_i32, %c0_i32_0 : i32, i32
  }
  func.func @transform_4(%arg0: i32) -> (i32, i32) {
    %c0_i32 = arith.constant 0 : i32
    %c0_i32_0 = arith.constant 0 : i32
    %c0_i32_1 = arith.constant 0 : i32
    return %c0_i32, %c0_i32_0 : i32, i32
  }
  func.func @transform_5(%arg0: i32) -> (i32, i32) {
    %c0_i32 = arith.constant 0 : i32
    %c0_i32_0 = arith.constant 0 : i32
    return %arg0, %c0_i32 : i32, i32
  }
}

</mosaic_0001>

<bundles_post_ra>
// kernel: tpu_custom_call.1
= control target key start
LH: loop header
LB: loop body
LE: loop exit
PB: predicated region body
PF: predicated region fallthrough
CT: control target
= control target key end

     0   :  { %10 = vsyncpa [#allocation3], 0  ;;  %vm36_vm0 = vcmask 1043456   ;;  %v238_v1 = vmov 0.0   ;;  %vm32_vm1 = vcmask 64512   ;;  %vm239_vm2 = vmmov 0   ;;  %s303_s0 = inlined_call_operand.vmem [shape: f32[2,8], index: 0, kind: input, shape index: {}]   ;;  %s304_s1 = inlined_call_operand.vmem [shape: bf16[8,32], index: 1, kind: input, shape index: {}]   ;;  %s305_s2 = inlined_call_operand.vmem [shape: f32[1,32], index: 2, kind: input, shape index: {}]   ;;  %s306_s3 = inlined_call_operand.vmem [shape: bf16[32,4], index: 3, kind: input, shape index: {}]   ;;  %s307_s4 = inlined_call_operand.vmem [shape: f32[1,4], index: 4, kind: input, shape index: {}]   ;;  %s308_s5 = inlined_call_operand.hbm [shape: f32[2,4], index: 5, kind: output, shape index: {}]  }
   0x1   :  { %v24_v0 = vld [vmem:[%s304_s1] sm:$0xf]  ;;  %187 = vmatprep.subr.bf16.mxu0 %v238_v1  ;;  %193 = vmatprep.subr.bf16.mxu1 %v238_v1  ;;  %v207_v6 = vld [vmem:[%s306_s3 + $0x8] sm:$0xff]   ;;  %vm105_vm3 = vcmask 261120   ;;  %vm153_vm4 = vcmask 31744  }
   0x2   :  { %v38_v2 = vsel %vm36_vm0, %v24_v0, 0  ;;  %v22_v3 = vld [vmem:[%s303_s0] sm:$0xff]  ;;  %189 = vmatprep.mubr.msk.bf16.mxu0 %vm239_vm2, %v238_v1  ;;  %197 = vmatprep.mubr.msk.bf16.mxu1 %vm239_vm2, %v238_v1 }
   0x3   :  { %188 = vmatpush3.bf16.msra.mxu0 %v38_v2  ;;  %v23_v4 = vpack.c.bf16 %v22_v3, %v22_v3  ;;  %v206_v5 = vld [vmem:[%s306_s3] sm:$0xff]  }
   0x4   :  { %194 = vmatpush3.bf16.msra.mxu1 %v206_v5  ;;  %v176_v7 = vld [vmem:[%s305_s2] ss:$0 sm:$0xff] }
   0x5   :  { %195 = vmatprep.subr.bf16.mxu1 %v238_v1  ;;  %v178_v15 = vld [vmem:[%s307_s4] ss:$0 sm:$0xff] }
   0x6   :  { %190 = vmatmul.mubr.msk.bf16.vlgmr.msra.gmra.mrb[0].mxu0 %vm32_vm1, %v23_v4 }
   0x8   :  { %196 = vmatpush3.bf16.msra.mxu1 %v207_v6 }
  0xd9   :  { %v74_v8 = vpop.f32.mrb[0].mxu0 }
  0xda   :  { %v75_v9 = vadd.f32 %v176_v7, %v74_v8  ;;  %v191_v10 = vpop.f32.mrb[1].mxu0 }
  0xdb   :  { %v77_v11 = vpop.f32.mrb[2].mxu0 }
  0xdc   :  { %v80_v12 = vmax.f32 %v75_v9, 0.0  ;;  %v192_v13 = vpop.f32.mrb[3].mxu0 }
  0xde   :  { %v81_v14 = vpack.c.bf16 %v80_v12, %v80_v12 }
  0xe0   :  { %198 = vmatmul.mubr.msk.bf16.vlgmr.msra.gmra.mrb[0].mxu1 %vm105_vm3, %v81_v14 }
 0x1b3   :  { %v143_v16 = vpop.f32.mrb[0].mxu1 }
 0x1b4   :  { %v144_v17 = vadd.f32 %v178_v15, %v143_v16  ;;  %v199_v18 = vpop.f32.mrb[1].mxu1 }
 0x1b5   :  { %v146_v19 = vpop.f32.mrb[2].mxu1 }
 0x1b6   :  { %v149_v20 = vmax.f32 %v144_v17, 0.0  ;;  %v200_v21 = vpop.f32.mrb[3].mxu1 }
 0x1b8   :  { %208 = vtanh.f32 %v149_v20 }
 0x1c2   :  { %v209_v22 = vpop.eup %208 }
 0x1c3   :  { %v151_v23 = vmul.f32 1.442695, %v209_v22 }
 0x1c5   :  { %210 = vpow2.f32 %v151_v23 }
 0x1cf   :  { %v211_v24 = vpop.eup %210 }
 0x1d0   :  { %v154_v25 = vsel %vm153_vm4, %v211_v24, 0.0 }
 0x1d1   :  { %155 = vadd.xlane.f32.xlu0 %v154_v25 }
 0x25e   :  { %v156_v26 = vpop.xlane.xlu0 %155 }
 0x25f   :  { %212 = vrcp.f32 %v156_v26 }
 0x269   :  { %v213_v27 = vpop.eup %212 }
 0x26a   :  { %v158_v28 = vmul.f32 %v213_v27, %v211_v24 }
 0x26c   :  { %159 = vst.msk [vmem:[#allocation2] sm:$0xff] %vm153_vm4, %v158_v28 }
 0x26d   :  { %164 = vsyncadd [#allocation3], 96  ;;  %s240_s2 = smov [#allocation2]  }
 0x26e   :  { %s165_s3 = sshll.u32 %s240_s2, 4  ;;  %s166_s3 = int_to_ptr.vmem [resolvable:$true] %s165_s3 }
 0x26f   :  { %s214_s4 = scalar_lea.vmem %s166_s3, 32  ;;  %s218_s28 = scalar_lea.vmem %s166_s3, 128 }
 0x270   :  { %p215_p0 = scmp.ne.s32.totalorder %s166_s3, %s214_s4  ;;  %p219_p1 = scmp.lt.s32.totalorder %s166_s3, %s166_s3 }
 0x271   :  { %p220_p2 = scmp.lt.s32.totalorder %s218_s28, %s214_s4 }
 0x273   :  { %p221_p3 = por %p220_p2, %p219_p1 }
 0x275   :  { %p222_p4 = pnand %p221_p3, %p215_p0 }
 0x277   :  { %225 = shalt.err (!%p222_p4)
}
 0x278   :  { %s226_s6 = scalar_lea.hbm %s308_s5, 32 }
 0x279   :  { %p227_p5 = scmp.ne.s32.totalorder %s308_s5, %s226_s6  ;;  %p230_p6 = scmp.lt.u32.totalorder %s226_s6, %s308_s5 }
 0x27b   :  { %p232_p7 = pnand %p230_p6, %p227_p5 }
 0x27d   :  { %235 = shalt.err (!%p232_p7)
}
 0x27e   :  { %s241_s11 = smov 32   ;;  %s242_s12 = smov 2  }
 0x27f   :  { %171 = dma.vmem_to_hbm [thread:$0]  %s166_s3, 32, %s308_s5, [#allocation3], %s241_s11, %s241_s11, %s242_s12  }
 0x280   :  { %236 = dma.done.wait [#allocation3], 128  }
 0x281   :  { %237 = vsyncadd [#allocation3], 4294967168 }
 0x282   :  { %175 = vsyncpa [#allocation3], 1 }

</bundles_post_ra>
